<compile_context>
chip_gen: v7x
topology: tpu7x:2x2x1
jax: 0.10.0
libtpu: 0.0.40
codegen_flags: <defaults>
</compile_context>

<pallas_src>
import functools
import math

import numpy as np
import jax
import jax.numpy as jnp
from jax.experimental import pallas as pl
from jax.experimental.pallas import tpu as pltpu


def _round_up(x, m):
    return -(-x // m) * m


def _gelu_tanh(x):
    c = 0.7978845608028654  # sqrt(2/pi)
    return 0.5 * x * (1.0 + jnp.tanh(c * (x + 0.044715 * (x * x * x))))


def _stack_kernel(*refs, nbatch, cfgs, eps):
    """Whole Conv1d+BN(+GELU) stack in one kernel.

    refs = (x_slab, [w(K,Cout,Cin), gamma(Cout,1), beta(Cout,1), mask(1,out_w)] * nl,
            out2d, [pingpong buf] * (0 or 2))

    Slab layout: batch n's position l of a layer's input lives at column
    G + n*W + l; guard/slack columns are zero.  Per tap k the slice starting at
    column k*dil (stride s) reproduces the conv for ALL batches at once.
    """
    nl = len(cfgs)
    x_ref = refs[0]
    prm = refs[1:1 + 4 * nl]
    o_ref = refs[1 + 4 * nl]
    bufs = refs[2 + 4 * nl:]

    src = x_ref
    for i, (c_in, c_out, ksz, stride, dil, l_out, out_w) in enumerate(cfgs):
        w_ref, g_ref, b_ref, m_ref = prm[4 * i:4 * i + 4]

        # ---- Conv1d: K per-tap MXU matmuls accumulated in f32 (no im2col) ----
        acc = None
        for k in range(ksz):
            start = k * dil
            if stride == 1:
                xs = src[0:c_in, start:start + out_w]
            else:
                # TODO(synk): pre-decimate for stride>1 (lane-strided reads slow on v5e)
                xs = src[0:c_in, pl.ds(start, out_w, stride)]
            part = jnp.dot(w_ref[k], xs, preferred_element_type=jnp.float32)
            acc = part if acc is None else acc + part
        # Conv bias omitted on purpose: it cancels exactly under training-mode BatchNorm.

        # ---- BatchNorm1d over valid (non-pad) columns only; one pass over `acc` ----
        mask = m_ref[...]                               # (1, out_w), 1.0 on valid cols
        am = acc * mask
        inv_cnt = 1.0 / float(nbatch * l_out)
        s1 = jnp.sum(am, axis=1, keepdims=True)         # (C_out, 1)
        s2 = jnp.sum(am * acc, axis=1, keepdims=True)   # (C_out, 1)
        mean = s1 * inv_cnt
        var = jnp.maximum(s2 * inv_cnt - mean * mean, 0.0)
        scale = g_ref[...] * jax.lax.rsqrt(var + eps)   # (C_out, 1)
        shift = b_ref[...] - mean * scale
        y = acc * scale + shift                         # single FMA per element

        if i != nl - 1:
            # GELU (tanh form -> EUP), then zero guard/slack columns so the next
            # layer's boundary taps read true zeros (this stands in for conv padding).
            y = _gelu_tanh(y) * mask
            buf = bufs[i % 2]
            buf[0:c_out, 0:out_w] = y.astype(buf.dtype)
            src = buf
        else:
            o_ref[...] = y.astype(o_ref.dtype)


def conv1ds_stack(x, params, strides, paddings, dilatations, eps=1e-5,
                  mxu_dtype=jnp.bfloat16):
    """x: (N, C_in0, L0); params: sequence of (w, bias, gamma, beta), w (C_out, C_in, K).

    Returns (N, C_out_last, L_out_last) float32.  Training-mode BatchNorm statistics.
    """
    n, c0, l0 = x.shape
    nl = len(params)
    strides = list(strides)
    paddings = list(paddings)
    dilatations = list(dilatations)

    # ---------------- static per-layer geometry ----------------
    c_ins, c_outs, ks, l_ins, l_outs = [], [], [], [], []
    c_in, l_in = c0, l0
    for (w, _b, _g, _be), s, p, d in zip(params, strides, paddings, dilatations):
        c_out, c_in_w, ksz = w.shape
        assert c_in_w == c_in, (c_in_w, c_in)
        l_out = (l_in + 2 * p - d * (ksz - 1) - 1) // s + 1
        assert l_out > 0
        c_ins.append(c_in); c_outs.append(c_out); ks.append(ksz)
        l_ins.append(l_in); l_outs.append(l_out)
        c_in, l_in = c_out, l_out

    # ---------------- slab layout (lane-dense, per-batch slots) ----------------
    # Slot width W[i] per layer; W[i+1] = W[i] / stride_i so one (strided) slice per tap
    # covers all batches.  W chosen >= l_in + pad and rounded so widths are 128-aligned.
    P = [1]
    for s in strides:
        P.append(P[-1] * s)
    base = max(max(P[i] * (l_ins[i] + paddings[i]) for i in range(nl)),
               P[nl] * l_outs[-1])
    m = (P[nl] * 128) // math.gcd(P[nl], 128)
    W0 = _round_up(base, m)
    W = [W0 // P[i] for i in range(nl + 1)]

    # Left guards of zeros stand in for conv left-padding: G[i] = s_i*G[i+1] + pad_i.
    G = [0] * (nl + 1)
    for i in range(nl - 1, -1, -1):
        G[i] = strides[i] * G[i + 1] + paddings[i]

    # Buffer widths, backward, so every tap read stays in bounds; all multiples of 128.
    out_w = [0] * nl
    in_w = [0] * nl
    out_w[nl - 1] = _round_up(n * W[nl], 128)
    for i in range(nl - 1, -1, -1):
        need = max(G[i] + n * W[i],
                   dilatations[i] * (ks[i] - 1) + strides[i] * (out_w[i] - 1) + 1)
        in_w[i] = _round_up(need, 128)
        if i > 0:
            out_w[i - 1] = in_w[i]

    def full_spec(shape):
        nd = len(shape)
        return pl.BlockSpec(shape, lambda i, _nd=nd: (0,) * _nd)

    # ---------------- kernel inputs ----------------
    kern_inputs = []
    in_specs = []
    cfgs = []

    # Layer-0 input slab: padding + batch slotting done here (XLA), not in the kernel.
    xt = jnp.transpose(x.astype(jnp.float32), (1, 0, 2))            # (C0, N, L0)
    xt = jnp.pad(xt, ((0, 0), (0, 0), (0, W[0] - l0)))               # slot width W0
    x2 = xt.reshape(c0, n * W[0])
    x2 = jnp.pad(x2, ((0, 0), (G[0], in_w[0] - G[0] - n * W[0])))    # guard + right slack
    x2 = x2.astype(mxu_dtype)
    kern_inputs.append(x2)
    in_specs.append(full_spec(x2.shape))

    flops = 0
    transcendentals = 0
    bytes_accessed = int(np.prod(x2.shape)) * x2.dtype.itemsize

    for i in range(nl):
        w, _bias, g, be = params[i]                    # bias unused: cancels under BN
        wk = jnp.transpose(w.astype(mxu_dtype), (2, 0, 1))   # (K, C_out, C_in)
        g2 = g.reshape(c_outs[i], 1).astype(jnp.float32)
        be2 = be.reshape(c_outs[i], 1).astype(jnp.float32)

        # Column validity mask for this layer's output slab (also zeroes pad columns).
        mk = np.zeros((1, out_w[i]), np.float32)
        for nn in range(n):
            st = G[i + 1] + nn * W[i + 1]
            mk[0, st:st + l_outs[i]] = 1.0
        mk = jnp.asarray(mk)

        kern_inputs += [wk, g2, be2, mk]
        in_specs += [full_spec(wk.shape), full_spec(g2.shape),
                     full_spec(be2.shape), full_spec(mk.shape)]
        cfgs.append((c_ins[i], c_outs[i], ks[i], strides[i], dilatations[i],
                     l_outs[i], out_w[i]))

        flops += 2 * ks[i] * c_outs[i] * c_ins[i] * out_w[i] + 10 * c_outs[i] * out_w[i]
        if i != nl - 1:
            transcendentals += c_outs[i] * out_w[i]
        bytes_accessed += int(wk.size) * 2 + (int(g2.size) + int(be2.size) + int(mk.size)) * 4

    out_shape = (c_outs[-1], out_w[-1])
    bytes_accessed += out_shape[0] * out_shape[1] * 4

    # Two ping-pong activation buffers (bf16) sized to the per-layer maximum.
    scratch = []
    scratch_bytes = 0
    if nl > 1:
        max_c = _round_up(max(c_ins[1:]), 8)
        max_w = max(out_w[:-1])
        itemsize = jnp.dtype(mxu_dtype).itemsize
        scratch = [pltpu.VMEM((max_c, max_w), mxu_dtype),
                   pltpu.VMEM((max_c, max_w), mxu_dtype)]
        scratch_bytes = 2 * max_c * max_w * itemsize

    vmem_est = (2 * sum(int(np.prod(a.shape)) * a.dtype.itemsize for a in kern_inputs)
                + 2 * out_shape[0] * out_shape[1] * 4 + scratch_bytes)
    vmem_limit = int(min(64 << 20, max(vmem_est + (2 << 20), 8 << 20)))

    kern = functools.partial(_stack_kernel, nbatch=n, cfgs=tuple(cfgs), eps=eps)

    y2d = pl.pallas_call(
        kern,
        out_shape=jax.ShapeDtypeStruct(out_shape, jnp.float32),
        grid=(1,),
        in_specs=in_specs,
        out_specs=full_spec(out_shape),
        scratch_shapes=scratch,
        compiler_params=pltpu.CompilerParams(
            dimension_semantics=("arbitrary",),
            vmem_limit_bytes=vmem_limit),
        cost_estimate=pl.CostEstimate(flops=flops,
                                      transcendentals=transcendentals,
                                      bytes_accessed=bytes_accessed),
    )(*kern_inputs)

    # Valid output columns: batch n at [n*W_last, n*W_last + l_out_last); recover (N,C,L).
    y = y2d[:, :n * W[nl]].reshape(c_outs[-1], n, W[nl])[:, :, :l_outs[-1]]
    return jnp.transpose(y, (1, 0, 2))


def _reference(x, params, strides, paddings, dilatations, eps=1e-5):
    """Pure-JAX reference (f32) for the Conv1ds forward (training-mode BN, tanh GELU)."""
    y = x.astype(jnp.float32)
    nl = len(params)
    for i, ((w, b, g, be), s, p, d) in enumerate(
            zip(params, strides, paddings, dilatations)):
        y = jax.lax.conv_general_dilated(
            y, w.astype(jnp.float32), window_strides=(s,), padding=[(p, p)],
            rhs_dilation=(d,), dimension_numbers=("NCH", "OIH", "NCH"))
        y = y + b[None, :, None]
        mean = jnp.mean(y, axis=(0, 2), keepdims=True)
        var = jnp.mean((y - mean) ** 2, axis=(0, 2), keepdims=True)
        y = (y - mean) * jax.lax.rsqrt(var + eps) * g[None, :, None] + be[None, :, None]
        if i != nl - 1:
            y = _gelu_tanh(y)
    if y.shape[1] == 1:
        y = y[:, 0, :]
    return y[..., None]


class Conv1dsPallas:
    """JAX/Pallas port of Conv1ds (stack of Conv1d+BatchNorm1d, GELU between layers)."""

    def __init__(self, in_channels, out_channels, kernels, strides=None,
                 paddings=None, dilatations=None, eps=1e-5,
                 mxu_dtype=jnp.bfloat16, key=None):
        self.nlayers = len(in_channels)
        assert self.nlayers == len(out_channels) == len(kernels)
        self.strides = list(strides) if strides is not None else self.nlayers * [1]
        self.paddings = list(paddings) if paddings is not None else self.nlayers * [0]
        self.dilatations = (list(dilatations) if dilatations is not None
                            else self.nlayers * [1])
        self.eps = eps
        self.mxu_dtype = mxu_dtype
        if key is None:
            key = jax.random.PRNGKey(0)
        self.params = []
        for i, o, k in zip(in_channels, out_channels, kernels):
            key, wk_, bk_ = jax.random.split(key, 3)
            bound = 1.0 / math.sqrt(i * k)              # torch Conv1d default init bound
            w = jax.random.uniform(wk_, (o, i, k), jnp.float32, -bound, bound)
            # bias kept for parity with torch's parameter set, but NOT used by the
            # kernel: under training-mode BN it cancels exactly against the batch mean.
            b = jax.random.uniform(bk_, (o,), jnp.float32, -bound, bound)
            gamma = jnp.ones((o,), jnp.float32)         # BatchNorm1d init
            beta = jnp.zeros((o,), jnp.float32)
            self.params.append((w, b, gamma, beta))
        self._forward = jax.jit(self._forward_impl)

    def _forward_impl(self, x, params):
        y = conv1ds_stack(x, params, self.strides, self.paddings, self.dilatations,
                          eps=self.eps, mxu_dtype=self.mxu_dtype)
        # torch: x.squeeze(1).unsqueeze(-1)
        if y.shape[1] == 1:
            y = y[:, 0, :]
        return y[..., None]

    def __call__(self, x):
        return self._forward(x, tuple(self.params))


if __name__ == "__main__":
    key = jax.random.PRNGKey(0)
    k_in, k_params = jax.random.split(key)

    in_channels = [4, 8]
    out_channels = [8, 1]
    kernels = [3, 3]

    model = Conv1dsPallas(in_channels, out_channels, kernels, key=k_params)

    x = jax.random.normal(k_in, (2, 4, 16), jnp.float32)     # (N, C_in, L)
    out = model(x)
    out = jax.block_until_ready(out)

    assert out.shape == (2, 12, 1), out.shape                # (N, L_out, 1)
    assert bool(jnp.all(jnp.isfinite(out)))

    # Loose-tolerance check vs. a pure-JAX f32 reference (kernel matmuls run in bf16).
    ref = jax.block_until_ready(
        jax.jit(functools.partial(_reference,
                                  strides=model.strides, paddings=model.paddings,
                                  dilatations=model.dilatations, eps=model.eps)
                )(x, tuple(model.params)))
    np.testing.assert_allclose(np.asarray(out), np.asarray(ref), rtol=1e-1, atol=1e-1)

    print("KERNEL_OK")
</pallas_src>

<mosaic_0001>
module attributes {stable_mosaic.version = 11 : i64} {
  func.func @_stack_kernel(%arg0: i32, %arg1: memref<4x512xbf16, #tpu.memory_space<vmem>>, %arg2: memref<3x8x4xbf16, #tpu.memory_space<vmem>>, %arg3: memref<8x1xf32, #tpu.memory_space<vmem>>, %arg4: memref<8x1xf32, #tpu.memory_space<vmem>>, %arg5: memref<1x384xf32, #tpu.memory_space<vmem>>, %arg6: memref<3x1x8xbf16, #tpu.memory_space<vmem>>, %arg7: memref<1x1xf32, #tpu.memory_space<vmem>>, %arg8: memref<1x1xf32, #tpu.memory_space<vmem>>, %arg9: memref<1x256xf32, #tpu.memory_space<vmem>>, %arg10: memref<1x256xf32, #tpu.memory_space<vmem>>, %arg11: memref<8x384xbf16, #tpu.memory_space<vmem>>, %arg12: memref<8x384xbf16, #tpu.memory_space<vmem>>) attributes {dimension_semantics = [#tpu.dimension_semantics<arbitrary>], iteration_bounds = array<i64: 1>, scalar_prefetch = 0 : i64, scratch_operands = 2 : i64, tpu.core_type = #tpu.core_type<tc>, window_params = [{pipeline_mode = #tpu.pipeline_mode<synchronous>, transform_indices = @transform_0, window_bounds = array<i64: 4, 512>}, {pipeline_mode = #tpu.pipeline_mode<synchronous>, transform_indices = @transform_1, window_bounds = array<i64: 3, 8, 4>}, {pipeline_mode = #tpu.pipeline_mode<synchronous>, transform_indices = @transform_2, window_bounds = array<i64: 8, 1>}, {pipeline_mode = #tpu.pipeline_mode<synchronous>, transform_indices = @transform_3, window_bounds = array<i64: 8, 1>}, {pipeline_mode = #tpu.pipeline_mode<synchronous>, transform_indices = @transform_4, window_bounds = array<i64: 1, 384>}, {pipeline_mode = #tpu.pipeline_mode<synchronous>, transform_indices = @transform_5, window_bounds = array<i64: 3, 1, 8>}, {pipeline_mode = #tpu.pipeline_mode<synchronous>, transform_indices = @transform_6, window_bounds = array<i64: 1, 1>}, {pipeline_mode = #tpu.pipeline_mode<synchronous>, transform_indices = @transform_7, window_bounds = array<i64: 1, 1>}, {pipeline_mode = #tpu.pipeline_mode<synchronous>, transform_indices = @transform_8, window_bounds = array<i64: 1, 256>}, {pipeline_mode = #tpu.pipeline_mode<synchronous>, transform_indices = @transform_9, window_bounds = array<i64: 1, 256>}]} {
    %c0 = arith.constant 0 : index
    %c0_0 = arith.constant 0 : index
    %0 = vector.load %arg1[%c0, %c0_0] : memref<4x512xbf16, #tpu.memory_space<vmem>>, vector<4x384xbf16>
    %c0_1 = arith.constant 0 : index
    %c0_2 = arith.constant 0 : index
    %c0_3 = arith.constant 0 : index
    %1 = vector.load %arg2[%c0_1, %c0_2, %c0_3] : memref<3x8x4xbf16, #tpu.memory_space<vmem>>, vector<1x8x4xbf16>
    %2 = vector.shape_cast %1 : vector<1x8x4xbf16> to vector<8x4xbf16>
    %cst = arith.constant dense<0.000000e+00> : vector<8x384xf32>
    %3 = tpu.matmul %2, %0, %cst {dimension_numbers = #tpu.dot_dimension_numbers<[1], [0], [0], [1], [0, 0, 1, 1], [], []>} : vector<8x4xbf16>, vector<4x384xbf16>, vector<8x384xf32> -> vector<8x384xf32>
    %c0_4 = arith.constant 0 : index
    %c1 = arith.constant 1 : index
    %4 = vector.load %arg1[%c0_4, %c1] : memref<4x512xbf16, #tpu.memory_space<vmem>>, vector<4x384xbf16>
    %c1_5 = arith.constant 1 : index
    %c0_6 = arith.constant 0 : index
    %c0_7 = arith.constant 0 : index
    %5 = vector.load %arg2[%c1_5, %c0_6, %c0_7] : memref<3x8x4xbf16, #tpu.memory_space<vmem>>, vector<1x8x4xbf16>
    %6 = vector.shape_cast %5 : vector<1x8x4xbf16> to vector<8x4xbf16>
    %cst_8 = arith.constant dense<0.000000e+00> : vector<8x384xf32>
    %7 = tpu.matmul %6, %4, %cst_8 {dimension_numbers = #tpu.dot_dimension_numbers<[1], [0], [0], [1], [0, 0, 1, 1], [], []>} : vector<8x4xbf16>, vector<4x384xbf16>, vector<8x384xf32> -> vector<8x384xf32>
    %8 = arith.addf %3, %7 : vector<8x384xf32>
    %c0_9 = arith.constant 0 : index
    %c2 = arith.constant 2 : index
    %9 = vector.load %arg1[%c0_9, %c2] : memref<4x512xbf16, #tpu.memory_space<vmem>>, vector<4x384xbf16>
    %c2_10 = arith.constant 2 : index
    %c0_11 = arith.constant 0 : index
    %c0_12 = arith.constant 0 : index
    %10 = vector.load %arg2[%c2_10, %c0_11, %c0_12] : memref<3x8x4xbf16, #tpu.memory_space<vmem>>, vector<1x8x4xbf16>
    %11 = vector.shape_cast %10 : vector<1x8x4xbf16> to vector<8x4xbf16>
    %cst_13 = arith.constant dense<0.000000e+00> : vector<8x384xf32>
    %12 = tpu.matmul %11, %9, %cst_13 {dimension_numbers = #tpu.dot_dimension_numbers<[1], [0], [0], [1], [0, 0, 1, 1], [], []>} : vector<8x4xbf16>, vector<4x384xbf16>, vector<8x384xf32> -> vector<8x384xf32>
    %13 = arith.addf %8, %12 : vector<8x384xf32>
    %c0_14 = arith.constant 0 : index
    %c0_15 = arith.constant 0 : index
    %14 = vector.load %arg5[%c0_14, %c0_15] : memref<1x384xf32, #tpu.memory_space<vmem>>, vector<1x384xf32>
    %15 = vector.broadcast %14 : vector<1x384xf32> to vector<8x384xf32>
    %16 = arith.mulf %13, %15 : vector<8x384xf32>
    %cst_16 = arith.constant dense<0.000000e+00> : vector<8xf32>
    %17 = vector.multi_reduction <add>, %16, %cst_16 [1] : vector<8x384xf32> to vector<8xf32>
    %18 = vector.shape_cast %17 : vector<8xf32> to vector<8x1xf32>
    %19 = arith.mulf %16, %13 : vector<8x384xf32>
    %cst_17 = arith.constant dense<0.000000e+00> : vector<8xf32>
    %20 = vector.multi_reduction <add>, %19, %cst_17 [1] : vector<8x384xf32> to vector<8xf32>
    %21 = vector.shape_cast %20 : vector<8xf32> to vector<8x1xf32>
    %cst_18 = arith.constant 0.0357142873 : f32
    %22 = vector.broadcast %cst_18 : f32 to vector<8x1xf32>
    %23 = arith.mulf %18, %22 : vector<8x1xf32>
    %cst_19 = arith.constant 0.0357142873 : f32
    %24 = vector.broadcast %cst_19 : f32 to vector<8x1xf32>
    %25 = arith.mulf %21, %24 : vector<8x1xf32>
    %26 = arith.mulf %23, %23 : vector<8x1xf32>
    %27 = arith.subf %25, %26 : vector<8x1xf32>
    %cst_20 = arith.constant 0.000000e+00 : f32
    %28 = vector.broadcast %cst_20 : f32 to vector<8x1xf32>
    %29 = arith.maximumf %27, %28 : vector<8x1xf32>
    %c0_21 = arith.constant 0 : index
    %c0_22 = arith.constant 0 : index
    %30 = vector.load %arg3[%c0_21, %c0_22] : memref<8x1xf32, #tpu.memory_space<vmem>>, vector<8x1xf32>
    %cst_23 = arith.constant 9.99999974E-6 : f32
    %31 = vector.broadcast %cst_23 : f32 to vector<8x1xf32>
    %32 = arith.addf %29, %31 : vector<8x1xf32>
    %33 = math.rsqrt %32 : vector<8x1xf32>
    %34 = arith.mulf %30, %33 : vector<8x1xf32>
    %c0_24 = arith.constant 0 : index
    %c0_25 = arith.constant 0 : index
    %35 = vector.load %arg4[%c0_24, %c0_25] : memref<8x1xf32, #tpu.memory_space<vmem>>, vector<8x1xf32>
    %36 = arith.mulf %23, %34 : vector<8x1xf32>
    %37 = arith.subf %35, %36 : vector<8x1xf32>
    %38 = vector.broadcast %34 : vector<8x1xf32> to vector<8x384xf32>
    %39 = arith.mulf %13, %38 : vector<8x384xf32>
    %40 = vector.broadcast %37 : vector<8x1xf32> to vector<8x384xf32>
    %41 = arith.addf %39, %40 : vector<8x384xf32>
    %cst_26 = arith.constant 5.000000e-01 : f32
    %42 = vector.broadcast %cst_26 : f32 to vector<8x384xf32>
    %43 = arith.mulf %42, %41 : vector<8x384xf32>
    %44 = arith.mulf %41, %41 : vector<8x384xf32>
    %45 = arith.mulf %44, %41 : vector<8x384xf32>
    %cst_27 = arith.constant 4.471500e-02 : f32
    %46 = vector.broadcast %cst_27 : f32 to vector<8x384xf32>
    %47 = arith.mulf %46, %45 : vector<8x384xf32>
    %48 = arith.addf %41, %47 : vector<8x384xf32>
    %cst_28 = arith.constant 0.797884583 : f32
    %49 = vector.broadcast %cst_28 : f32 to vector<8x384xf32>
    %50 = arith.mulf %49, %48 : vector<8x384xf32>
    %51 = math.tanh %50 : vector<8x384xf32>
    %cst_29 = arith.constant 1.000000e+00 : f32
    %52 = vector.broadcast %cst_29 : f32 to vector<8x384xf32>
    %53 = arith.addf %52, %51 : vector<8x384xf32>
    %54 = arith.mulf %43, %53 : vector<8x384xf32>
    %55 = vector.broadcast %14 : vector<1x384xf32> to vector<8x384xf32>
    %56 = arith.mulf %54, %55 : vector<8x384xf32>
    %57 = arith.truncf %56 : vector<8x384xf32> to vector<8x384xbf16>
    %c0_30 = arith.constant 0 : index
    %c0_31 = arith.constant 0 : index
    %58 = vector.load %arg11[%c0_30, %c0_31] : memref<8x384xbf16, #tpu.memory_space<vmem>>, vector<8x384xbf16>
    tpu.vector_store %arg11[%c0_30, %c0_31], %57 {strides = array<i32>} : memref<8x384xbf16, #tpu.memory_space<vmem>>, vector<8x384xbf16>,
    %c0_32 = arith.constant 0 : index
    %c0_33 = arith.constant 0 : index
    %59 = vector.load %arg11[%c0_32, %c0_33] : memref<8x384xbf16, #tpu.memory_space<vmem>>, vector<8x256xbf16>
    %c0_34 = arith.constant 0 : index
    %c0_35 = arith.constant 0 : index
    %c0_36 = arith.constant 0 : index
    %60 = vector.load %arg6[%c0_34, %c0_35, %c0_36] : memref<3x1x8xbf16, #tpu.memory_space<vmem>>, vector<1x1x8xbf16>
    %61 = vector.shape_cast %60 : vector<1x1x8xbf16> to vector<1x8xbf16>
    %cst_37 = arith.constant dense<0.000000e+00> : vector<1x256xf32>
    %62 = tpu.matmul %61, %59, %cst_37 {dimension_numbers = #tpu.dot_dimension_numbers<[1], [0], [0], [1], [0, 0, 1, 1], [], []>} : vector<1x8xbf16>, vector<8x256xbf16>, vector<1x256xf32> -> vector<1x256xf32>
    %c0_38 = arith.constant 0 : index
    %c1_39 = arith.constant 1 : index
    %63 = vector.load %arg11[%c0_38, %c1_39] : memref<8x384xbf16, #tpu.memory_space<vmem>>, vector<8x256xbf16>
    %c1_40 = arith.constant 1 : index
    %c0_41 = arith.constant 0 : index
    %c0_42 = arith.constant 0 : index
    %64 = vector.load %arg6[%c1_40, %c0_41, %c0_42] : memref<3x1x8xbf16, #tpu.memory_space<vmem>>, vector<1x1x8xbf16>
    %65 = vector.shape_cast %64 : vector<1x1x8xbf16> to vector<1x8xbf16>
    %cst_43 = arith.constant dense<0.000000e+00> : vector<1x256xf32>
    %66 = tpu.matmul %65, %63, %cst_43 {dimension_numbers = #tpu.dot_dimension_numbers<[1], [0], [0], [1], [0, 0, 1, 1], [], []>} : vector<1x8xbf16>, vector<8x256xbf16>, vector<1x256xf32> -> vector<1x256xf32>
    %67 = arith.addf %62, %66 : vector<1x256xf32>
    %c0_44 = arith.constant 0 : index
    %c2_45 = arith.constant 2 : index
    %68 = vector.load %arg11[%c0_44, %c2_45] : memref<8x384xbf16, #tpu.memory_space<vmem>>, vector<8x256xbf16>
    %c2_46 = arith.constant 2 : index
    %c0_47 = arith.constant 0 : index
    %c0_48 = arith.constant 0 : index
    %69 = vector.load %arg6[%c2_46, %c0_47, %c0_48] : memref<3x1x8xbf16, #tpu.memory_space<vmem>>, vector<1x1x8xbf16>
    %70 = vector.shape_cast %69 : vector<1x1x8xbf16> to vector<1x8xbf16>
    %cst_49 = arith.constant dense<0.000000e+00> : vector<1x256xf32>
    %71 = tpu.matmul %70, %68, %cst_49 {dimension_numbers = #tpu.dot_dimension_numbers<[1], [0], [0], [1], [0, 0, 1, 1], [], []>} : vector<1x8xbf16>, vector<8x256xbf16>, vector<1x256xf32> -> vector<1x256xf32>
    %72 = arith.addf %67, %71 : vector<1x256xf32>
    %c0_50 = arith.constant 0 : index
    %c0_51 = arith.constant 0 : index
    %73 = vector.load %arg9[%c0_50, %c0_51] : memref<1x256xf32, #tpu.memory_space<vmem>>, vector<1x256xf32>
    %74 = arith.mulf %72, %73 : vector<1x256xf32>
    %cst_52 = arith.constant dense<0.000000e+00> : vector<1xf32>
    %75 = vector.multi_reduction <add>, %74, %cst_52 [1] : vector<1x256xf32> to vector<1xf32>
    %76 = vector.shape_cast %75 : vector<1xf32> to vector<1x1xf32>
    %77 = arith.mulf %74, %72 : vector<1x256xf32>
    %cst_53 = arith.constant dense<0.000000e+00> : vector<1xf32>
    %78 = vector.multi_reduction <add>, %77, %cst_53 [1] : vector<1x256xf32> to vector<1xf32>
    %79 = vector.shape_cast %78 : vector<1xf32> to vector<1x1xf32>
    %cst_54 = arith.constant 0.0416666679 : f32
    %80 = vector.broadcast %cst_54 : f32 to vector<1x1xf32>
    %81 = arith.mulf %76, %80 : vector<1x1xf32>
    %cst_55 = arith.constant 0.0416666679 : f32
    %82 = vector.broadcast %cst_55 : f32 to vector<1x1xf32>
    %83 = arith.mulf %79, %82 : vector<1x1xf32>
    %84 = arith.mulf %81, %81 : vector<1x1xf32>
    %85 = arith.subf %83, %84 : vector<1x1xf32>
    %cst_56 = arith.constant 0.000000e+00 : f32
    %86 = vector.broadcast %cst_56 : f32 to vector<1x1xf32>
    %87 = arith.maximumf %85, %86 : vector<1x1xf32>
    %c0_57 = arith.constant 0 : index
    %c0_58 = arith.constant 0 : index
    %88 = vector.load %arg7[%c0_57, %c0_58] : memref<1x1xf32, #tpu.memory_space<vmem>>, vector<1x1xf32>
    %cst_59 = arith.constant 9.99999974E-6 : f32
    %89 = vector.broadcast %cst_59 : f32 to vector<1x1xf32>
    %90 = arith.addf %87, %89 : vector<1x1xf32>
    %91 = math.rsqrt %90 : vector<1x1xf32>
    %92 = arith.mulf %88, %91 : vector<1x1xf32>
    %c0_60 = arith.constant 0 : index
    %c0_61 = arith.constant 0 : index
    %93 = vector.load %arg8[%c0_60, %c0_61] : memref<1x1xf32, #tpu.memory_space<vmem>>, vector<1x1xf32>
    %94 = arith.mulf %81, %92 : vector<1x1xf32>
    %95 = arith.subf %93, %94 : vector<1x1xf32>
    %96 = vector.broadcast %92 : vector<1x1xf32> to vector<1x256xf32>
    %97 = arith.mulf %72, %96 : vector<1x256xf32>
    %98 = vector.broadcast %95 : vector<1x1xf32> to vector<1x256xf32>
    %99 = arith.addf %97, %98 : vector<1x256xf32>
    %c0_62 = arith.constant 0 : index
    %c0_63 = arith.constant 0 : index
    %100 = vector.load %arg10[%c0_62, %c0_63] : memref<1x256xf32, #tpu.memory_space<vmem>>, vector<1x256xf32>
    tpu.vector_store %arg10[%c0_62, %c0_63], %99 {strides = array<i32>} : memref<1x256xf32, #tpu.memory_space<vmem>>, vector<1x256xf32>,
    return
  }
  func.func @transform_0(%arg0: i32) -> (i32, i32) {
    %c0_i32 = arith.constant 0 : i32
    %c0_i32_0 = arith.constant 0 : i32
    %c0_i32_1 = arith.constant 0 : i32
    return %c0_i32, %c0_i32_0 : i32, i32
  }
  func.func @transform_1(%arg0: i32) -> (i32, i32, i32) {
    %c0_i32 = arith.constant 0 : i32
    %c0_i32_0 = arith.constant 0 : i32
    %c0_i32_1 = arith.constant 0 : i32
    %c0_i32_2 = arith.constant 0 : i32
    return %c0_i32, %c0_i32_0, %c0_i32_1 : i32, i32, i32
  }
  func.func @transform_2(%arg0: i32) -> (i32, i32) {
    %c0_i32 = arith.constant 0 : i32
    %c0_i32_0 = arith.constant 0 : i32
    %c0_i32_1 = arith.constant 0 : i32
    return %c0_i32, %c0_i32_0 : i32, i32
  }
  func.func @transform_3(%arg0: i32) -> (i32, i32) {
    %c0_i32 = arith.constant 0 : i32
    %c0_i32_0 = arith.constant 0 : i32
    %c0_i32_1 = arith.constant 0 : i32
    return %c0_i32, %c0_i32_0 : i32, i32
  }
  func.func @transform_4(%arg0: i32) -> (i32, i32) {
    %c0_i32 = arith.constant 0 : i32
    %c0_i32_0 = arith.constant 0 : i32
    %c0_i32_1 = arith.constant 0 : i32
    return %c0_i32, %c0_i32_0 : i32, i32
  }
  func.func @transform_5(%arg0: i32) -> (i32, i32, i32) {
    %c0_i32 = arith.constant 0 : i32
    %c0_i32_0 = arith.constant 0 : i32
    %c0_i32_1 = arith.constant 0 : i32
    %c0_i32_2 = arith.constant 0 : i32
    return %c0_i32, %c0_i32_0, %c0_i32_1 : i32, i32, i32
  }
  func.func @transform_6(%arg0: i32) -> (i32, i32) {
    %c0_i32 = arith.constant 0 : i32
    %c0_i32_0 = arith.constant 0 : i32
    %c0_i32_1 = arith.constant 0 : i32
    return %c0_i32, %c0_i32_0 : i32, i32
  }
  func.func @transform_7(%arg0: i32) -> (i32, i32) {
    %c0_i32 = arith.constant 0 : i32
    %c0_i32_0 = arith.constant 0 : i32
    %c0_i32_1 = arith.constant 0 : i32
    return %c0_i32, %c0_i32_0 : i32, i32
  }
  func.func @transform_8(%arg0: i32) -> (i32, i32) {
    %c0_i32 = arith.constant 0 : i32
    %c0_i32_0 = arith.constant 0 : i32
    %c0_i32_1 = arith.constant 0 : i32
    return %c0_i32, %c0_i32_0 : i32, i32
  }
  func.func @transform_9(%arg0: i32) -> (i32, i32) {
    %c0_i32 = arith.constant 0 : i32
    %c0_i32_0 = arith.constant 0 : i32
    %c0_i32_1 = arith.constant 0 : i32
    return %c0_i32, %c0_i32_0 : i32, i32
  }
}

</mosaic_0001>

<bundles_post_ra>
// kernel: _forward_impl.1
= control target key start
LH: loop header
LB: loop body
LE: loop exit
PB: predicated region body
PF: predicated region fallthrough
CT: control target
= control target key end

     0   :  { %s1125_s0 = inlined_call_operand.vmem [shape: bf16[4,512], index: 0, kind: input, shape index: {}]   ;;  %s1126_s1 = inlined_call_operand.vmem [shape: bf16[3,8,4], index: 1, kind: input, shape index: {}]   ;;  %s1127_s2 = inlined_call_operand.vmem [shape: f32[8,1], index: 2, kind: input, shape index: {}]   ;;  %s1128_s3 = inlined_call_operand.vmem [shape: f32[8,1], index: 3, kind: input, shape index: {}]   ;;  %s1129_s4 = inlined_call_operand.vmem [shape: f32[1,384], index: 4, kind: input, shape index: {}]   ;;  %s1130_s5 = inlined_call_operand.vmem [shape: bf16[3,1,8], index: 5, kind: input, shape index: {}]   ;;  %s1131_s6 = inlined_call_operand.<no memory space> [shape: f32[1,1], index: 6, kind: input, shape index: {}]   ;;  %s1132_s8 = inlined_call_operand.vmem [shape: f32[1,256], index: 8, kind: input, shape index: {}]   ;;  %s1133_s9 = inlined_call_operand.hbm [shape: f32[1,256], index: 9, kind: output, shape index: {}]   ;;  %s1134_s7 = inlined_call_operand.<no memory space> [shape: f32[1,1], index: 7, kind: input, shape index: {}]  }
   0x1   :  { %v14_v0 = vstv %s1131_s6  ;;  %v16_v1 = vstv %s1134_s7 }
   0x2   :  { %15 = vst [vmem:[#allocation4] sm:$0x1] %v14_v0  ;;  %17 = vst [vmem:[#allocation5] sm:$0x1] %v16_v1 }
   0x3   :  { %v40_v2 = vld [vmem:[%s1125_s0] sm:$0xff]  ;;  %v48_v3 = vlaneseq  ;;  %v923_v4 = vmov 1983009808   ;;  %v924_v7 = vmov 0  }
   0x4   :  { %v46_v5 = vunpack.c.l.s4 %v923_v4  ;;  %229 = vmatprep.mubr.bf16.mxu0 %v924_v7  ;;  %119 = vmatprep.mubr.bf16.mxu1 %v924_v7 }
   0x5   :  { %v991_v6 = vshrl.u32 %v48_v3, 7 }
   0x6   :  { %18 = vsyncpa [#allocation7], 0  ;;  %v47_v8 = vunpack.c.0.s8 %v46_v5  ;;  %v44_v9 = vcombine.high %v40_v2, %v40_v2  ;;  %882 = vset.pattern.permute.xlu0 %v924_v7  ;;  %883 = vset.pattern.permute.xlu1 %v924_v7  ;;  %v38_v10 = vld [vmem:[%s1125_s0] sm:$0x3f]  ;;  %vm77_vm0 = vcmask 1041408   ;;  %s925_s15 = smov 127  }
   0x7   :  { %v169_v15 = vcombine.high %v38_v10, %v38_v10  ;;  %v39_v20 = vld [vmem:[%s1126_s1] sm:$0xf]  ;;  %vm73_vm1 = vcmask 31744   ;;  %s926_s17 = smov 126   ;;  %vm69_vm2 = vcmask 1039360   ;;  %vm307_vm3 = vcmask 1031168  }
   0x8   :  { %v50_v11 = vsub.s32 %v47_v8, %v991_v6  ;;  %v800_v30 = vld [vmem:[%s1126_s1 + $0x4] sm:$0xf]  ;;  %v927_v32 = vmov 0.0   ;;  %vm928_vm4 = vmmov 0   ;;  %v807_v39 = vld [vmem:[%s1126_s1 + $0x8] sm:$0xf] }
   0x9   :  { %v1045_v54 = vsub.s32 0, %v991_v6  ;;  %v415_v55 = vsub.s32 1, %v991_v6  ;;  %v407_v56 = vld [vmem:[%s1129_s4] sm:$0x7]  ;;  %v419_v59 = vsub.s32 2, %v991_v6  ;;  %vm537_vm5 = vcmask 1043456  }
   0xa   :  { %v51_v12 = vrot.slane %v40_v2, %v50_v11  ;;  %v58_v13 = vrot.slane %v44_v9, %v50_v11  ;;  %v176_v14 = vrot.slane %v38_v10, %v50_v11  ;;  %v183_v21 = vrot.slane %v169_v15, %v50_v11 }
   0xb   :  { %v1052_v57 = vrot.slane %v407_v56, %v1045_v54  ;;  %v1056_v58 = vrot.slane %v407_v56, %v415_v55  ;;  %v1061_v62 = vrot.slane %v407_v56, %v419_v59  ;;  %vm533_vm6 = vcmask 64512  }
   0xc   :  { %61 = vrot.lane.b32.xlu0 %v51_v12, %s925_s15  ;;  %v59_v16 = vcombine.high %v51_v12, %v51_v12  ;;  %65 = vrot.lane.b32.xlu1 %v58_v13, %s925_s15  ;;  %v60_v17 = vcombine.high %v58_v13, %v58_v13  ;;  %v184_v18 = vcombine.high %v176_v14, %v176_v14  ;;  %v189_v19 = vsel %vm77_vm0, %v176_v14, 0 }
   0xd   :  { %v195_v40 = vsel %vm77_vm0, %v183_v21, 0  ;;  %vm716_vm7 = vcmask 1040384   ;;  %vm783_vm8 = vcmp.lt.s32.totalorder %v48_v3, 256 }
   0xe   :  { %804 = vmatprep.subr.msk.bf16.mxu0 %vm77_vm0, %v184_v18 }
   0xf   :  { %198 = vmatpush1.bf16.msra.mxu0 %v189_v19 }
  0x10   :  { %63 = vrot.lane.b32.xlu0 %v59_v16, %s925_s15  ;;  %67 = vrot.lane.b32.xlu1 %v60_v17, %s925_s15 }
  0x12   :  { %805 = vmatmul.mubr.msk.bf16.vlgmr.msra.gmra.mrb[0].mxu0 %vm73_vm1, %v39_v20 }
  0x13   :  { %355 = vmatprep.mubr.bf16.mxu0 %v924_v7 }
  0x14   :  { %299 = vrot.lane.b32.xlu0 %v51_v12, %s926_s17  ;;  %301 = vrot.lane.b32.xlu1 %v59_v16, %s926_s17 }
  0x18   :  { %303 = vrot.lane.b32.xlu0 %v58_v13, %s926_s17  ;;  %305 = vrot.lane.b32.xlu1 %v60_v17, %s926_s17 }
  0x7e   :  { %v62_v22 = vpop.permute.xlu0 %61  ;;  %v66_v23 = vpop.permute.xlu1 %65 }
  0x82   :  { %v64_v24 = vpop.permute.xlu0 %63  ;;  %v68_v25 = vpop.permute.xlu1 %67 }
  0x83   :  { %v71_v26 = vsel %vm69_vm2, %v64_v24, %v66_v23  ;;  %v70_v27 = vsel %vm69_vm2, %v62_v22, %v64_v24  ;;  %v72_v29 = vsel %vm69_vm2, %v66_v23, %v68_v25  ;;  %v443_v22 = vld [vmem:[%s1127_s2] sm:$0xff] }
  0x84   :  { %801 = vmatprep.subr.msk.bf16.mxu1 %vm77_vm0, %v71_v26  ;;  %v79_v28 = vsel %vm77_vm0, %v70_v27, 0  ;;  %v85_v35 = vsel %vm77_vm0, %v72_v29, 0  ;;  %v447_v25 = vld [vmem:[%s1128_s3] sm:$0xff] }
  0x85   :  { %88 = vmatpush1.bf16.msra.mxu1 %v79_v28 }
  0x86   :  { %v300_v31 = vpop.permute.xlu0 %299  ;;  %834 = vmatprep.subr.bf16.mxu1 %v927_v32  ;;  %v302_v33 = vpop.permute.xlu1 %301 }
  0x87   :  { %v308_v34 = vsel %vm307_vm3, %v300_v31, %v302_v33 }
  0x88   :  { %802 = vmatmul.mubr.msk.bf16.vlgmr.msra.gmra.mrb[0].mxu1 %vm73_vm1, %v800_v30  ;;  %v315_v37 = vsel %vm77_vm0, %v308_v34, 0 }
  0x89   :  { %835 = vmatpush3.bf16.msra.mxu1 %v85_v35  ;;  %836 = vmatprep.mubr.msk.bf16.mxu1 %vm928_vm4, %v927_v32 }
  0x8a   :  { %v304_v36 = vpop.permute.xlu0 %303  ;;  %840 = vmatprep.subr.bf16.mxu1 %v927_v32  ;;  %v306_v41 = vpop.permute.xlu1 %305 }
  0x8b   :  { %v309_v38 = vsel %vm307_vm3, %v302_v33, %v304_v36  ;;  %v310_v42 = vsel %vm307_vm3, %v304_v36, %v306_v41 }
  0x8c   :  { %808 = vmatprep.subr.msk.bf16.mxu0 %vm77_vm0, %v309_v38  ;;  %v321_v43 = vsel %vm77_vm0, %v310_v42, 0 }
  0x8d   :  { %324 = vmatpush1.bf16.msra.mxu0 %v315_v37 }
  0x90   :  { %837 = vmatmul.mubr.msk.bf16.vlgmr.msra.gmra.mrb[4].mxu1 %vm73_vm1, %v800_v30  ;;  %809 = vmatmul.mubr.msk.bf16.vlgmr.msra.gmra.mrb[0].mxu0 %vm73_vm1, %v807_v39 }
  0x91   :  { %841 = vmatpush3.bf16.msra.mxu1 %v195_v40  ;;  %842 = vmatprep.mubr.msk.bf16.mxu1 %vm928_vm4, %v927_v32 }
  0x92   :  { %846 = vmatprep.subr.bf16.mxu1 %v927_v32  ;;  %576 = vmatprep.mubr.bf16.mxu0 %v924_v7 }
  0x9c   :  { %843 = vmatmul.mubr.msk.bf16.vlgmr.msra.gmra.mrb[4].mxu1 %vm73_vm1, %v39_v20 }
  0x9d   :  { %847 = vmatpush3.bf16.msra.mxu1 %v321_v43  ;;  %848 = vmatprep.mubr.msk.bf16.mxu1 %vm928_vm4, %v927_v32 }
  0xa8   :  { %849 = vmatmul.mubr.msk.bf16.vlgmr.msra.gmra.mrb[4].mxu1 %vm73_vm1, %v807_v39 }
 0x15b   :  { %v121_v44 = vpop.f32.mrb[0].mxu1 }
 0x15c   :  { %v123_v45 = vpop.f32.mrb[1].mxu1 }
 0x15d   :  { %v125_v46 = vpop.f32.mrb[2].mxu1 }
 0x15e   :  { %v126_v47 = vpop.f32.mrb[3].mxu1 }
 0x163   :  { %v357_v48 = vpop.f32.mrb[0].mxu0 }
 0x164   :  { %v852_v49 = vadd.f32 %v357_v48, %v121_v44  ;;  %v359_v50 = vpop.f32.mrb[1].mxu0 }
 0x165   :  { %v853_v51 = vadd.f32 %v359_v50, %v123_v45  ;;  %v361_v52 = vpop.f32.mrb[2].mxu0 }
 0x166   :  { %v362_v53 = vpop.f32.mrb[3].mxu0  ;;  %v424_v60 = vmul.f32 %v852_v49, %v1052_v57 }
 0x167   :  { %v425_v61 = vmul.f32 %v853_v51, %v1056_v58 }
 0x168   :  { %v431_v63 = vmul.f32 %v852_v49, %v424_v60 }
 0x169   :  { %v432_v0 = vmul.f32 %v853_v51, %v425_v61  ;;  %v427_v5 = vadd.f32 %v425_v61, %v424_v60 }
 0x16b   :  { %v434_v12 = vadd.f32 %v432_v0, %v431_v63 }
 0x17b   :  { %v398_v1 = vpop.f32.mrb[4].mxu1 }
 0x17c   :  { %v850_v2 = vpop.f32.mrb[5].mxu1  ;;  %v426_v4 = vmul.f32 %v1061_v62, %v398_v1 }
 0x17d   :  { %v401_v8 = vpop.f32.mrb[6].mxu1 }
 0x17e   :  { %v851_v9 = vpop.f32.mrb[7].mxu1  ;;  %v428_v10 = vadd.f32 %v427_v5, %v426_v4  ;;  %v433_v11 = vmul.f32 %v426_v4, %v398_v1 }
 0x180   :  { %429 = vadd.xlane.f32.xlu0 %v428_v10  ;;  %v435_v13 = vadd.f32 %v434_v12, %v433_v11 }
 0x182   :  { %436 = vadd.xlane.f32.xlu1 %v435_v13 }
 0x20d   :  { %v430_v14 = vpop.xlane.xlu0 %429 }
 0x20e   :  { %v438_v15 = vmul.f32 0.035714287, %v430_v14 }
 0x20f   :  { %v437_v16 = vpop.xlane.xlu1 %436 }
 0x210   :  { %v440_v17 = vmul.f32 %v438_v15, %v438_v15  ;;  %v439_v18 = vmul.f32 0.035714287, %v437_v16 }
 0x212   :  { %v441_v19 = vsub.f32 %v439_v18, %v440_v17  ;;  %v813_v17 = vld [vmem:[%s1130_s5 + $0x1] sm:$0x1] }
 0x214   :  { %v442_v20 = vmax.f32 %v441_v19, 0.0 }
 0x216   :  { %v444_v21 = vadd.f32 1e-05, %v442_v20 }
 0x218   :  { %887 = vrsqrt.f32 %v444_v21 }
 0x222   :  { %v888_v23 = vpop.eup %887 }
 0x223   :  { %v446_v24 = vmul.f32 %v888_v23, %v443_v22 }
 0x225   :  { %452 = vperm.xlu0 %882, %v446_v24   ;;  %v448_v26 = vmul.f32 %v446_v24, %v438_v15  ;;  %v512_v24 = vld [vmem:[%s1130_s5] sm:$0x1] }
 0x227   :  { %v449_v27 = vsub.f32 %v447_v25, %v448_v26  ;;  %v823_v26 = vld [vmem:[%s1130_s5 + $0x2] sm:$0x1]  ;;  %s930_s5 = smov [#allocation6]  }
 0x229   :  { %460 = vperm.xlu1 %883, %v449_v27   ;;  %v702_v27 = vld [vmem:[%s1132_s8] sm:$0x3]  ;;  %s792_s8 = sshll.u32 %s930_s5, 4  ;;  %s793_s8 = int_to_ptr.vmem [resolvable:$true] %s792_s8 }
 0x22a   :  { %s899_s11 = scalar_lea.vmem %s793_s8, 32  ;;  %p904_p1 = scmp.lt.s32.totalorder %s793_s8, %s793_s8 }
 0x22b   :  { %p900_p0 = scmp.ne.s32.totalorder %s793_s8, %s899_s11  ;;  %p905_p2 = scmp.lt.s32.totalorder %s899_s11, %s899_s11 }
 0x22d   :  { %p906_p3 = por %p905_p2, %p904_p1 }
 0x22f   :  { %p907_p4 = pnand %p906_p3, %p900_p0 }
 0x2a4   :  { %v453_v28 = vpop.permute.xlu0 %452 }
 0x2a5   :  { %v455_v29 = vmul.f32 %v852_v49, %v453_v28  ;;  %v456_v30 = vmul.f32 %v853_v51, %v453_v28  ;;  %v457_v31 = vmul.f32 %v453_v28, %v398_v1  ;;  %v707_v28 = vrot.slane %v702_v27, %v1045_v54 }
 0x2a8   :  { %v461_v32 = vpop.permute.xlu1 %460 }
 0x2a9   :  { %v463_v33 = vadd.f32 %v461_v32, %v455_v29  ;;  %v464_v34 = vadd.f32 %v461_v32, %v456_v30  ;;  %v465_v35 = vadd.f32 %v461_v32, %v457_v31  ;;  %v711_v29 = vrot.slane %v702_v27, %v415_v55 }
 0x2ab   :  { %v469_v36 = vmul.f32 %v463_v33, %v463_v33  ;;  %v470_v37 = vmul.f32 %v464_v34, %v464_v34  ;;  %v471_v38 = vmul.f32 %v465_v35, %v465_v35  ;;  %v466_v53 = vmul.f32 0.5, %v463_v33 }
 0x2ac   :  { %v467_v60 = vmul.f32 0.5, %v464_v34  ;;  %v468_v63 = vmul.f32 0.5, %v465_v35 }
 0x2ad   :  { %v472_v39 = vmul.f32 %v469_v36, %v463_v33  ;;  %v473_v40 = vmul.f32 %v470_v37, %v464_v34  ;;  %v474_v41 = vmul.f32 %v471_v38, %v465_v35 }
 0x2af   :  { %v475_v42 = vmul.f32 0.044715, %v472_v39  ;;  %v476_v43 = vmul.f32 0.044715, %v473_v40  ;;  %v477_v44 = vmul.f32 0.044715, %v474_v41 }
 0x2b1   :  { %v478_v45 = vadd.f32 %v475_v42, %v463_v33  ;;  %v479_v46 = vadd.f32 %v476_v43, %v464_v34  ;;  %v480_v47 = vadd.f32 %v477_v44, %v465_v35 }
 0x2b3   :  { %v481_v48 = vmul.f32 0.7978846, %v478_v45  ;;  %v482_v49 = vmul.f32 0.7978846, %v479_v46  ;;  %v483_v50 = vmul.f32 0.7978846, %v480_v47 }
 0x2b5   :  { %889 = vtanh.f32 %v481_v48 }
 0x2b6   :  { %891 = vtanh.f32 %v482_v49 }
 0x2b7   :  { %893 = vtanh.f32 %v483_v50  ;;  %v734_v50 = vld [vmem:[#allocation4] sm:$0x1] }
 0x2bf   :  { %v890_v51 = vpop.eup %889 }
 0x2c0   :  { %v892_v52 = vpop.eup %891  ;;  %v487_v56 = vadd.f32 1.0, %v890_v51 }
 0x2c1   :  { %v894_v59 = vpop.eup %893  ;;  %v488_v61 = vadd.f32 1.0, %v892_v52 }
 0x2c2   :  { %v489_v0 = vadd.f32 1.0, %v894_v59  ;;  %v490_v1 = vmul.f32 %v487_v56, %v466_v53  ;;  %v738_v53 = vld [vmem:[#allocation5] sm:$0x1] }
 0x2c3   :  { %v491_v2 = vmul.f32 %v488_v61, %v467_v60  ;;  %v929_v60 = vmov 1966171168  }
 0x2c4   :  { %v492_v4 = vmul.f32 %v489_v0, %v468_v63  ;;  %v493_v5 = vmul.f32 %v490_v1, %v1052_v57  ;;  %v767_v61 = vunpack.c.l.s4 %v929_v60 }
 0x2c5   :  { %v494_v8 = vmul.f32 %v491_v2, %v1056_v58 }
 0x2c6   :  { %v495_v9 = vmul.f32 %v492_v4, %v1061_v62  ;;  %v897_v11 = vpack.c.bf16 %v493_v5, %v493_v5  ;;  %v768_v1 = vunpack.c.0.s8 %v767_v61 }
 0x2c7   :  { %v898_v12 = vpack.c.bf16 %v494_v8, %v494_v8 }
 0x2c8   :  { %v827_v10 = vpack.c.bf16 %v495_v9, %v495_v9  ;;  %525 = vrot.lane.b32.xlu1 %v897_v11, %s925_s15  ;;  %v594_v19 = vsel %vm537_vm5, %v897_v11, 0 }
 0x2ca   :  { %510 = vst [vmem:[#allocation2 + $0x8] sm:$0xf] %v827_v10 }
 0x2cc   :  { %527 = vrot.lane.b32.xlu1 %v898_v12, %s925_s15 }
 0x2d1   :  { %v886_v13 = vld [vmem:[#allocation2 + $0x8] ss:$0 sps:$4 sm:$0xff]  }
 0x2d2   :  { %529 = vrot.lane.b32.xlu1 %v886_v13, %s925_s15 }
 0x2d6   :  { %642 = vrot.lane.b32.xlu1 %v897_v11, %s926_s17  ;;  %v771_v11 = vsub.s32 %v768_v1, %v991_v6 }
 0x2da   :  { %644 = vrot.lane.b32.xlu1 %v898_v12, %s926_s17 }
 0x2de   :  { %646 = vrot.lane.b32.xlu1 %v886_v13, %s926_s17 }
 0x33a   :  { %v526_v57 = vpop.permute.xlu1 %525 }
 0x33e   :  { %v528_v58 = vpop.permute.xlu1 %527 }
 0x33f   :  { %v531_v62 = vsel %vm69_vm2, %v526_v57, %v528_v58 }
 0x340   :  { %v539_v16 = vsel %vm537_vm5, %v531_v62, 0 }
 0x344   :  { %v530_v14 = vpop.permute.xlu1 %529 }
 0x345   :  { %v532_v15 = vsel %vm69_vm2, %v528_v58, %v530_v14 }
 0x346   :  { %817 = vmatprep.subr.msk.bf16.mxu0 %vm537_vm5, %v532_v15 }
 0x347   :  { %545 = vmatpush1.bf16.msra.mxu0 %v539_v16 }
 0x348   :  { %v643_v18 = vpop.permute.xlu1 %642  ;;  %821 = vmatprep.subr.msk.bf16.mxu0 %vm537_vm5, %v898_v12 }
 0x34a   :  { %818 = vmatmul.mubr.msk.bf16.vlgmr.msra.gmra.mrb[4].mxu0 %vm533_vm6, %v813_v17 }
 0x34b   :  { %600 = vmatpush1.bf16.msra.mxu0 %v594_v19  ;;  %631 = vmatprep.mubr.bf16.mxu0 %v924_v7 }
 0x34c   :  { %v645_v20 = vpop.permute.xlu1 %644 }
 0x34d   :  { %v648_v23 = vsel %vm307_vm3, %v643_v18, %v645_v20 }
 0x34e   :  { %v654_v25 = vsel %vm537_vm5, %v648_v23, 0 }
 0x350   :  { %v647_v21 = vpop.permute.xlu1 %646 }
 0x351   :  { %v649_v22 = vsel %vm307_vm3, %v645_v20, %v647_v21 }
 0x352   :  { %824 = vmatprep.subr.msk.bf16.mxu0 %vm537_vm5, %v649_v22 }
 0x356   :  { %822 = vmatmul.mubr.msk.bf16.vlgmr.msra.gmra.mrb[4].mxu0 %vm533_vm6, %v512_v24 }
 0x357   :  { %660 = vmatpush1.bf16.msra.mxu0 %v654_v25  ;;  %691 = vmatprep.mubr.bf16.mxu0 %v924_v7 }
 0x362   :  { %825 = vmatmul.mubr.msk.bf16.vlgmr.msra.gmra.mrb[4].mxu0 %vm533_vm6, %v823_v26 }
 0x435   :  { %v693_v30 = vpop.f32.mrb[4].mxu0 }
 0x436   :  { %v714_v31 = vmul.f32 %v707_v28, %v693_v30  ;;  %v695_v32 = vpop.f32.mrb[5].mxu0 }
 0x437   :  { %v715_v7 = vmul.f32 %v711_v29, %v695_v32  ;;  %v697_v33 = vpop.f32.mrb[6].mxu0 }
 0x438   :  { %v722_v34 = vmul.f32 %v714_v31, %v693_v30  ;;  %v698_v35 = vpop.f32.mrb[7].mxu0  ;;  %v717_v36 = vsel %vm716_vm7, %v714_v31, 0.0 }
 0x439   :  { %v723_v37 = vmul.f32 %v715_v7, %v695_v32  ;;  %v718_v38 = vsel %vm716_vm7, %v715_v7, 0.0 }
 0x43a   :  { %v719_v39 = vadd.f32 %v718_v38, %v717_v36  ;;  %v724_v40 = vsel %vm716_vm7, %v722_v34, 0.0 }
 0x43b   :  { %v725_v41 = vsel %vm716_vm7, %v723_v37, 0.0 }
 0x43c   :  { %720 = vadd.xlane.f32.xlu0 %v719_v39  ;;  %v726_v42 = vadd.f32 %v725_v41, %v724_v40 }
 0x43e   :  { %727 = vadd.xlane.f32.xlu1 %v726_v42 }
 0x4c9   :  { %v721_v43 = vpop.xlane.xlu0 %720 }
 0x4ca   :  { %v729_v44 = vmul.f32 0.041666668, %v721_v43 }
 0x4cb   :  { %v728_v55 = vpop.xlane.xlu1 %727 }
 0x4cc   :  { %v731_v45 = vmul.f32 %v729_v44, %v729_v44  ;;  %v730_v46 = vmul.f32 0.041666668, %v728_v55 }
 0x4ce   :  { %v732_v47 = vsub.f32 %v730_v46, %v731_v45 }
 0x4d0   :  { %v733_v48 = vmax.f32 %v732_v47, 0.0 }
 0x4d2   :  { %v735_v49 = vadd.f32 1e-05, %v733_v48 }
 0x4d4   :  { %895 = vrsqrt.f32 %v735_v49 }
 0x4de   :  { %v896_v51 = vpop.eup %895 }
 0x4df   :  { %v737_v52 = vmul.f32 %v896_v51, %v734_v50 }
 0x4e1   :  { %743 = vperm.xlu0 %882, %v737_v52   ;;  %v739_v56 = vmul.f32 %v737_v52, %v729_v44 }
 0x4e3   :  { %v740_v59 = vsub.f32 %v738_v53, %v739_v56 }
 0x4e5   :  { %754 = vperm.xlu1 %883, %v740_v59  }
 0x560   :  { %v744_v63 = vpop.permute.xlu0 %743 }
 0x561   :  { %v749_v0 = vrot.slane %v744_v63, %v1045_v54 }
 0x563   :  { %v750_v4 = vmul.f32 %v749_v0, %v693_v30  ;;  %v751_v5 = vmul.f32 %v749_v0, %v695_v32 }
 0x564   :  { %v755_v2 = vpop.permute.xlu1 %754 }
 0x565   :  { %v760_v8 = vrot.slane %v755_v2, %v1045_v54 }
 0x567   :  { %v761_v9 = vadd.f32 %v760_v8, %v750_v4  ;;  %v762_v10 = vadd.f32 %v760_v8, %v751_v5 }
 0x569   :  { %v765_v12 = vcombine.low %v761_v9, %v762_v10 }
 0x56b   :  { %v772_v13 = vrot.slane %v765_v12, %v771_v11 }
 0x56d   :  { %v779_v57 = vrot.slane %v772_v13, %v771_v11 }
 0x56f   :  { %785 = vst.msk [vmem:[#allocation6] sm:$0x3] %vm783_vm8, %v779_v57 }
 0x570   :  { %910 = shalt.err (!%p907_p4)
}
 0x571   :  { %s911_s14 = scalar_lea.hbm %s1133_s9, 32 }
 0x572   :  { %p912_p5 = scmp.ne.s32.totalorder %s1133_s9, %s911_s14  ;;  %p915_p6 = scmp.lt.u32.totalorder %s911_s14, %s1133_s9 }
 0x574   :  { %p917_p7 = pnand %p915_p6, %p912_p5 }
 0x576   :  { %920 = shalt.err (!%p917_p7)
}
 0x577   :  { %795 = dma.vmem_to_hbm [thread:$0]  %s793_s8, 32, %s1133_s9, [#allocation7]  }
 0x578   :  { %921 = dma.done.wait [#allocation7], 32  }
 0x579   :  { %922 = vsyncadd [#allocation7], 4294967264 }
 0x57a   :  { %799 = vsyncpa [#allocation7], 1 }

</bundles_post_ra>
